<compile_context>
chip_gen: v5e
topology: v5e:2x2
jax: 0.10.0
libtpu: 0.0.40
codegen_flags: <defaults>
</compile_context>

<pallas_src>
import jax
import jax.numpy as jnp
import numpy as np
from jax.experimental import pallas as pl
from jax.experimental.pallas import tpu as pltpu


def _triplet_exp_kernel(feat_full_ref, feat_tile_ref, labc_ref, labr_ref, u_ref,
                        inv_t_ref, li_ref, valid_ref):
    f_full = feat_full_ref[...].astype(jnp.float32)          # (B, D), resident
    f_tile = feat_tile_ref[...].astype(jnp.float32)          # (TM, D), this tile's anchors
    B, D = f_full.shape
    TM = f_tile.shape[0]
    eps = 1e-6                                               # F.pairwise_distance eps

    # ---- F.normalize(p=2, dim=1), eps = 1e-12 -------------------------------
    nrm_full = jnp.sqrt(jnp.sum(f_full * f_full, axis=1, keepdims=True))   # (B,1)
    inv_full = 1.0 / jnp.maximum(nrm_full, 1e-12)
    fn_full = f_full * inv_full                                            # (B,D)
    nrm_tile = jnp.sqrt(jnp.sum(f_tile * f_tile, axis=1, keepdims=True))   # (TM,1)
    inv_tile = 1.0 / jnp.maximum(nrm_tile, 1e-12)
    fn_tile = f_tile * inv_tile                                            # (TM,D)

    # per-sample scalars for the exact eps-corrected squared distance:
    #   ||x - y + eps||^2 = b_x + a_y - 2 * <x, y>
    sqn_full = jnp.square(nrm_full * inv_full)   # == 1 except degenerate rows (exact)
    sqn_tile = jnp.square(nrm_tile * inv_tile)
    s_full = jnp.sum(fn_full, axis=1, keepdims=True)          # (B,1)
    s_tile = jnp.sum(fn_tile, axis=1, keepdims=True)          # (TM,1)
    a_col = sqn_full - (2.0 * eps) * s_full                   # (B,1)
    b_row = sqn_tile + (2.0 * eps) * s_tile + (D * eps * eps)  # (TM,1)

    # ---- masks (everything below is (TM, B), never (B, B)) ------------------
    labc = labc_ref[...]                                       # (TM,1) int32
    labr = labr_ref[...]                                       # (1,B)  int32
    col = jax.lax.broadcasted_iota(jnp.int32, (TM, B), 1)
    row_g = jax.lax.broadcasted_iota(jnp.int32, (TM, B), 0) + pl.program_id(0) * TM
    same = labc == labr                                        # (TM,B) bool
    pos_mask = jnp.logical_and(same, row_g != col)             # same class, not self
    pos_f = pos_mask.astype(jnp.float32)
    n_pos = jnp.sum(pos_f, axis=1, keepdims=True)              # (TM,1)
    # negatives exist  <=>  class size (n_pos + 1) < B
    valid = jnp.logical_and(n_pos > 0.0, n_pos < float(B - 1)).astype(jnp.float32)

    # ---- one Gram matmul drives mining AND the distances --------------------
    gram = jax.lax.dot_general(fn_tile, fn_full, (((1,), (1,)), ((), ())),
                               preferred_element_type=jnp.float32)          # (TM,B)

    # hardest negative = max cosine similarity over different-class columns
    # (== argmin of squared distance for normalized rows); first tie wins.
    gram_neg = jnp.where(same, -jnp.inf, gram)
    best = jnp.max(gram_neg, axis=1, keepdims=True)            # (TM,1)
    neg_idx = jnp.min(jnp.where(gram_neg == best, col, B), axis=1, keepdims=True)
    neg_sel = col == neg_idx                                    # one-hot (or all-false)

    # random positive: the floor(u * n_pos)-th same-class non-self column.
    # Exclusive prefix count of positives along j (Hillis-Steele, log2(B) steps,
    # pure slice+concat+add -> no O(B^3) matmul, no resident (B,B) operand).
    inc = pos_f
    shift = 1
    while shift < B:
        inc = inc + jnp.concatenate(
            [jnp.zeros((TM, shift), jnp.float32), inc[:, : B - shift]], axis=1)
        shift *= 2
    rank = inc - pos_f                                          # exclusive count
    k = jnp.floor(u_ref[...] * n_pos)                           # (TM,1)
    k = jnp.minimum(k, jnp.maximum(n_pos - 1.0, 0.0))
    # rank and k are small integer-valued f32 (< 2^24), so the equality is exact.
    pos_sel = jnp.logical_and(pos_mask, rank == k)              # one-hot

    # gather the selected cosine sims (masked row-sums) and the per-selected-
    # sample scalar a_j via tiny (TM,B)@(B,1) matvecs (no (TM,B)@(B,D) gathers).
    gram_p = jnp.sum(jnp.where(pos_sel, gram, 0.0), axis=1, keepdims=True)  # (TM,1)
    gram_n = jnp.sum(jnp.where(neg_sel, gram, 0.0), axis=1, keepdims=True)
    a_p = jax.lax.dot_general(pos_sel.astype(jnp.float32), a_col,
                              (((1,), (0,)), ((), ())),
                              preferred_element_type=jnp.float32)           # (TM,1)
    a_n = jax.lax.dot_general(neg_sel.astype(jnp.float32), a_col,
                              (((1,), (0,)), ((), ())),
                              preferred_element_type=jnp.float32)

    # F.pairwise_distance(x, y, p=2, eps=1e-6) = ||x - y + eps||_2
    pos_dist = jnp.sqrt(jnp.maximum(b_row + a_p - 2.0 * gram_p, 0.0))       # (TM,1)
    neg_dist = jnp.sqrt(jnp.maximum(b_row + a_n - 2.0 * gram_n, 0.0))

    inv_t = inv_t_ref[0, 0]     # 1 / min(temperature + 0.04 * epoch, 1)
    li = jnp.log(1.0 + jnp.exp((pos_dist - neg_dist) * inv_t))              # (TM,1)

    li_ref[...] = li * valid          # per-anchor weighted loss partials
    valid_ref[...] = valid            # per-anchor triplet-valid flags


def _pick_tile(batch):
    for tm in (256, 128, 512, 64, 32, 16, 8):
        if batch % tm == 0:
            return tm
    return batch


def triplet_loss_with_exp_upd(features, labels, epoch, u, temperature=0.3):
    """features: (B, D), labels: (B,) int, u: (B,) uniforms in [0,1) -> scalar loss."""
    B, D = features.shape
    labels = jnp.asarray(labels, jnp.int32)
    lab_col = labels.reshape(B, 1)
    lab_row = labels.reshape(1, B)
    u = jnp.asarray(u, jnp.float32).reshape(B, 1)
    t = min(temperature + 0.04 * float(epoch), 1.0)
    inv_t = jnp.full((1, 1), 1.0 / t, dtype=jnp.float32)   # scalar in SMEM, no recompiles

    TM = _pick_tile(B)
    grid = (B // TM,)
    vmem = pltpu.MemorySpace.VMEM
    smem = pltpu.MemorySpace.SMEM

    li, valid = pl.pallas_call(
        _triplet_exp_kernel,
        out_shape=(jax.ShapeDtypeStruct((B, 1), jnp.float32),
                   jax.ShapeDtypeStruct((B, 1), jnp.float32)),
        grid=grid,
        in_specs=[
            pl.BlockSpec((B, D), lambda i: (0, 0), memory_space=vmem),    # features, resident
            pl.BlockSpec((TM, D), lambda i: (i, 0), memory_space=vmem),   # anchor rows tile
            pl.BlockSpec((TM, 1), lambda i: (i, 0), memory_space=vmem),   # labels column tile
            pl.BlockSpec((1, B), lambda i: (0, 0), memory_space=vmem),    # labels row, resident
            pl.BlockSpec((TM, 1), lambda i: (i, 0), memory_space=vmem),   # per-anchor uniforms
            pl.BlockSpec(memory_space=smem),                              # inv temperature
        ],
        out_specs=(
            pl.BlockSpec((TM, 1), lambda i: (i, 0), memory_space=vmem),
            pl.BlockSpec((TM, 1), lambda i: (i, 0), memory_space=vmem),
        ),
        compiler_params=pltpu.CompilerParams(
            dimension_semantics=("parallel",),
            vmem_limit_bytes=48 * 1024 * 1024,
        ),
    )(features, features, lab_col, lab_row, u, inv_t)

    cnt = jnp.sum(valid)
    loss_sum = jnp.sum(li)
    return jnp.where(cnt > 0.0, loss_sum / jnp.maximum(cnt, 1.0), 0.0)


def _reference_loss(features, labels, u, temperature, epoch):
    """NumPy port of the PyTorch forward, sharing the same positive-choice uniforms."""
    f = np.asarray(features, dtype=np.float64)
    lab = np.asarray(labels)
    u = np.asarray(u, dtype=np.float32).reshape(-1)
    B, _ = f.shape
    fn = f / np.maximum(np.sqrt((f ** 2).sum(axis=1, keepdims=True)), 1e-12)
    t = min(temperature + 0.04 * epoch, 1.0)
    losses = []
    for i in range(B):
        pos_idx = [j for j in range(B) if lab[j] == lab[i] and j != i]
        neg_idx = [j for j in range(B) if lab[j] != lab[i]]
        if not pos_idx or not neg_idx:
            continue
        k = int(np.floor(np.float32(u[i]) * np.float32(len(pos_idx))))
        k = min(k, len(pos_idx) - 1)
        pj = pos_idx[k]
        d2 = ((fn[i] - fn[neg_idx]) ** 2).sum(axis=1)
        nj = neg_idx[int(np.argmin(d2))]
        pd = np.sqrt(((fn[i] - fn[pj] + 1e-6) ** 2).sum())
        nd = np.sqrt(((fn[i] - fn[nj] + 1e-6) ** 2).sum())
        losses.append(np.log1p(np.exp((pd - nd) / t)))
    if not losses:
        return 0.0
    return float(np.mean(losses))


if __name__ == "__main__":
    key = jax.random.PRNGKey(0)
    kf, ku = jax.random.split(key)

    B, D = 8, 32  # batch_size x embedding_dim
    features = jax.random.normal(kf, (B, D), dtype=jnp.float32)
    labels = jnp.array([0, 0, 1, 1, 2, 2, 0, 1], dtype=jnp.int32)   # repeated classes
    u = jax.random.uniform(ku, (B,), dtype=jnp.float32)             # positive-choice randomness
    epoch = 2
    temperature = 0.3

    loss = triplet_loss_with_exp_upd(features, labels, epoch, u, temperature)
    loss = jax.block_until_ready(loss)

    ref = _reference_loss(np.asarray(features), np.asarray(labels), np.asarray(u),
                          temperature, epoch)
    assert np.allclose(float(loss), ref, rtol=1e-4, atol=1e-6), (float(loss), ref)

    print("KERNEL_OK")
</pallas_src>

<mosaic_0001>
module attributes {stable_mosaic.version = 11 : i64} {
  func.func @_triplet_exp_kernel(%arg0: i32, %arg1: memref<8x32xf32, #tpu.memory_space<vmem>>, %arg2: memref<8x32xf32, #tpu.memory_space<vmem>>, %arg3: memref<8x1xi32, #tpu.memory_space<vmem>>, %arg4: memref<1x8xi32, #tpu.memory_space<vmem>>, %arg5: memref<8x1xf32, #tpu.memory_space<vmem>>, %arg6: memref<1x1xf32, #tpu.memory_space<smem>>, %arg7: memref<8x1xf32, #tpu.memory_space<vmem>>, %arg8: memref<8x1xf32, #tpu.memory_space<vmem>>) attributes {dimension_semantics = [#tpu.dimension_semantics<parallel>], iteration_bounds = array<i64: 1>, scalar_prefetch = 0 : i64, scratch_operands = 0 : i64, tpu.core_type = #tpu.core_type<tc>, window_params = [{pipeline_mode = #tpu.pipeline_mode<synchronous>, transform_indices = @transform_0, window_bounds = array<i64: 8, 32>}, {transform_indices = @transform_1, window_bounds = array<i64: 8, 32>}, {transform_indices = @transform_2, window_bounds = array<i64: 8, 1>}, {pipeline_mode = #tpu.pipeline_mode<synchronous>, transform_indices = @transform_3, window_bounds = array<i64: 1, 8>}, {transform_indices = @transform_4, window_bounds = array<i64: 8, 1>}, {transform_indices = @transform_5, window_bounds = array<i64: 1, 1>}, {transform_indices = @transform_6, window_bounds = array<i64: 8, 1>}, {transform_indices = @transform_7, window_bounds = array<i64: 8, 1>}]} {
    %c0 = arith.constant 0 : index
    %c0_0 = arith.constant 0 : index
    %0 = vector.load %arg1[%c0, %c0_0] : memref<8x32xf32, #tpu.memory_space<vmem>>, vector<8x32xf32>
    %c0_1 = arith.constant 0 : index
    %c0_2 = arith.constant 0 : index
    %1 = vector.load %arg2[%c0_1, %c0_2] : memref<8x32xf32, #tpu.memory_space<vmem>>, vector<8x32xf32>
    %2 = arith.mulf %0, %0 : vector<8x32xf32>
    %cst = arith.constant dense<0.000000e+00> : vector<8xf32>
    %3 = vector.multi_reduction <add>, %2, %cst [1] : vector<8x32xf32> to vector<8xf32>
    %4 = vector.shape_cast %3 : vector<8xf32> to vector<8x1xf32>
    %5 = math.sqrt %4 : vector<8x1xf32>
    %cst_3 = arith.constant 9.99999996E-13 : f32
    %6 = vector.broadcast %cst_3 : f32 to vector<8x1xf32>
    %7 = arith.maximumf %5, %6 : vector<8x1xf32>
    %cst_4 = arith.constant 1.000000e+00 : f32
    %8 = vector.broadcast %cst_4 : f32 to vector<8x1xf32>
    %9 = arith.divf %8, %7 : vector<8x1xf32>
    %10 = vector.broadcast %9 : vector<8x1xf32> to vector<8x32xf32>
    %11 = arith.mulf %0, %10 : vector<8x32xf32>
    %12 = arith.mulf %1, %1 : vector<8x32xf32>
    %cst_5 = arith.constant dense<0.000000e+00> : vector<8xf32>
    %13 = vector.multi_reduction <add>, %12, %cst_5 [1] : vector<8x32xf32> to vector<8xf32>
    %14 = vector.shape_cast %13 : vector<8xf32> to vector<8x1xf32>
    %15 = math.sqrt %14 : vector<8x1xf32>
    %cst_6 = arith.constant 9.99999996E-13 : f32
    %16 = vector.broadcast %cst_6 : f32 to vector<8x1xf32>
    %17 = arith.maximumf %15, %16 : vector<8x1xf32>
    %cst_7 = arith.constant 1.000000e+00 : f32
    %18 = vector.broadcast %cst_7 : f32 to vector<8x1xf32>
    %19 = arith.divf %18, %17 : vector<8x1xf32>
    %20 = vector.broadcast %19 : vector<8x1xf32> to vector<8x32xf32>
    %21 = arith.mulf %1, %20 : vector<8x32xf32>
    %22 = arith.mulf %5, %9 : vector<8x1xf32>
    %23 = arith.mulf %22, %22 : vector<8x1xf32>
    %24 = arith.mulf %15, %19 : vector<8x1xf32>
    %25 = arith.mulf %24, %24 : vector<8x1xf32>
    %cst_8 = arith.constant dense<0.000000e+00> : vector<8xf32>
    %26 = vector.multi_reduction <add>, %11, %cst_8 [1] : vector<8x32xf32> to vector<8xf32>
    %27 = vector.shape_cast %26 : vector<8xf32> to vector<8x1xf32>
    %cst_9 = arith.constant dense<0.000000e+00> : vector<8xf32>
    %28 = vector.multi_reduction <add>, %21, %cst_9 [1] : vector<8x32xf32> to vector<8xf32>
    %29 = vector.shape_cast %28 : vector<8xf32> to vector<8x1xf32>
    %cst_10 = arith.constant 2.000000e-06 : f32
    %30 = vector.broadcast %cst_10 : f32 to vector<8x1xf32>
    %31 = arith.mulf %30, %27 : vector<8x1xf32>
    %32 = arith.subf %23, %31 : vector<8x1xf32>
    %cst_11 = arith.constant 2.000000e-06 : f32
    %33 = vector.broadcast %cst_11 : f32 to vector<8x1xf32>
    %34 = arith.mulf %33, %29 : vector<8x1xf32>
    %35 = arith.addf %25, %34 : vector<8x1xf32>
    %cst_12 = arith.constant 3.200000e-11 : f32
    %36 = vector.broadcast %cst_12 : f32 to vector<8x1xf32>
    %37 = arith.addf %35, %36 : vector<8x1xf32>
    %c0_13 = arith.constant 0 : index
    %c0_14 = arith.constant 0 : index
    %38 = vector.load %arg3[%c0_13, %c0_14] : memref<8x1xi32, #tpu.memory_space<vmem>>, vector<8x1xi32>
    %c0_15 = arith.constant 0 : index
    %c0_16 = arith.constant 0 : index
    %39 = vector.load %arg4[%c0_15, %c0_16] : memref<1x8xi32, #tpu.memory_space<vmem>>, vector<1x8xi32>
    %40 = tpu.iota {dimensions = array<i32: 1>} : vector<8x8xi32>
    %41 = tpu.iota {dimensions = array<i32: 0>} : vector<8x8xi32>
    %c8_i32 = arith.constant 8 : i32
    %42 = arith.muli %arg0, %c8_i32 : i32
    %43 = vector.broadcast %42 : i32 to vector<8x8xi32>
    %44 = arith.addi %41, %43 : vector<8x8xi32>
    %45 = vector.broadcast %38 : vector<8x1xi32> to vector<8x8xi32>
    %46 = vector.broadcast %39 : vector<1x8xi32> to vector<8x8xi32>
    %47 = arith.cmpi eq, %45, %46 : vector<8x8xi32>
    %48 = arith.cmpi ne, %44, %40 : vector<8x8xi32>
    %49 = arith.andi %47, %48 : vector<8x8xi1>
    %50 = arith.extui %49 : vector<8x8xi1> to vector<8x8xi32>
    %51 = arith.sitofp %50 : vector<8x8xi32> to vector<8x8xf32>
    %cst_17 = arith.constant dense<0.000000e+00> : vector<8xf32>
    %52 = vector.multi_reduction <add>, %51, %cst_17 [1] : vector<8x8xf32> to vector<8xf32>
    %53 = vector.shape_cast %52 : vector<8xf32> to vector<8x1xf32>
    %cst_18 = arith.constant 0.000000e+00 : f32
    %54 = vector.broadcast %cst_18 : f32 to vector<8x1xf32>
    %55 = arith.cmpf ogt, %53, %54 : vector<8x1xf32>
    %cst_19 = arith.constant 7.000000e+00 : f32
    %56 = vector.broadcast %cst_19 : f32 to vector<8x1xf32>
    %57 = arith.cmpf olt, %53, %56 : vector<8x1xf32>
    %58 = arith.andi %55, %57 : vector<8x1xi1>
    %59 = arith.extui %58 : vector<8x1xi1> to vector<8x1xi32>
    %60 = arith.sitofp %59 : vector<8x1xi32> to vector<8x1xf32>
    %cst_20 = arith.constant dense<0.000000e+00> : vector<8x8xf32>
    %61 = tpu.matmul %21, %11, %cst_20 {dimension_numbers = #tpu.dot_dimension_numbers<[1], [1], [0], [0], [0, 0, 1, 0], [], []>} : vector<8x32xf32>, vector<8x32xf32>, vector<8x8xf32> -> vector<8x8xf32>
    %cst_21 = arith.constant 0xFF800000 : f32
    %62 = vector.broadcast %cst_21 : f32 to vector<8x8xf32>
    %63 = arith.select %47, %62, %61 : vector<8x8xi1>, vector<8x8xf32>
    %cst_22 = arith.constant dense<0xFF800000> : vector<8xf32>
    %64 = vector.multi_reduction <maximumf>, %63, %cst_22 [1] : vector<8x8xf32> to vector<8xf32>
    %65 = vector.shape_cast %64 : vector<8xf32> to vector<8x1xf32>
    %66 = vector.broadcast %65 : vector<8x1xf32> to vector<8x8xf32>
    %67 = arith.cmpf oeq, %63, %66 : vector<8x8xf32>
    %c8_i32_23 = arith.constant 8 : i32
    %68 = vector.broadcast %c8_i32_23 : i32 to vector<8x8xi32>
    %69 = arith.select %67, %40, %68 : vector<8x8xi1>, vector<8x8xi32>
    %cst_24 = arith.constant dense<2147483647> : vector<8xi32>
    %70 = vector.multi_reduction <minsi>, %69, %cst_24 [1] : vector<8x8xi32> to vector<8xi32>
    %71 = vector.shape_cast %70 : vector<8xi32> to vector<8x1xi32>
    %72 = vector.broadcast %71 : vector<8x1xi32> to vector<8x8xi32>
    %73 = arith.cmpi eq, %40, %72 : vector<8x8xi32>
    %cst_25 = arith.constant 0.000000e+00 : f32
    %74 = vector.broadcast %cst_25 : f32 to vector<8x1xf32>
    %75 = vector.extract_strided_slice %51 {offsets = [0, 0], sizes = [8, 7], strides = [1, 1]} : vector<8x8xf32> to vector<8x7xf32>
    %76 = tpu.concatenate %74, %75 in 1 : vector<8x1xf32>, vector<8x7xf32> -> vector<8x8xf32>
    %77 = arith.addf %51, %76 : vector<8x8xf32>
    %cst_26 = arith.constant 0.000000e+00 : f32
    %78 = vector.broadcast %cst_26 : f32 to vector<8x2xf32>
    %79 = vector.extract_strided_slice %77 {offsets = [0, 0], sizes = [8, 6], strides = [1, 1]} : vector<8x8xf32> to vector<8x6xf32>
    %80 = tpu.concatenate %78, %79 in 1 : vector<8x2xf32>, vector<8x6xf32> -> vector<8x8xf32>
    %81 = arith.addf %77, %80 : vector<8x8xf32>
    %cst_27 = arith.constant 0.000000e+00 : f32
    %82 = vector.broadcast %cst_27 : f32 to vector<8x4xf32>
    %83 = vector.extract_strided_slice %81 {offsets = [0, 0], sizes = [8, 4], strides = [1, 1]} : vector<8x8xf32> to vector<8x4xf32>
    %84 = tpu.concatenate %82, %83 in 1 : vector<8x4xf32>, vector<8x4xf32> -> vector<8x8xf32>
    %85 = arith.addf %81, %84 : vector<8x8xf32>
    %86 = arith.subf %85, %51 : vector<8x8xf32>
    %c0_28 = arith.constant 0 : index
    %c0_29 = arith.constant 0 : index
    %87 = vector.load %arg5[%c0_28, %c0_29] : memref<8x1xf32, #tpu.memory_space<vmem>>, vector<8x1xf32>
    %88 = arith.mulf %87, %53 : vector<8x1xf32>
    %89 = math.floor %88 : vector<8x1xf32>
    %cst_30 = arith.constant 1.000000e+00 : f32
    %90 = vector.broadcast %cst_30 : f32 to vector<8x1xf32>
    %91 = arith.subf %53, %90 : vector<8x1xf32>
    %cst_31 = arith.constant 0.000000e+00 : f32
    %92 = vector.broadcast %cst_31 : f32 to vector<8x1xf32>
    %93 = arith.maximumf %91, %92 : vector<8x1xf32>
    %94 = arith.minimumf %89, %93 : vector<8x1xf32>
    %95 = vector.broadcast %94 : vector<8x1xf32> to vector<8x8xf32>
    %96 = arith.cmpf oeq, %86, %95 : vector<8x8xf32>
    %97 = arith.andi %49, %96 : vector<8x8xi1>
    %cst_32 = arith.constant 0.000000e+00 : f32
    %98 = vector.broadcast %cst_32 : f32 to vector<8x8xf32>
    %99 = arith.select %97, %61, %98 : vector<8x8xi1>, vector<8x8xf32>
    %cst_33 = arith.constant dense<0.000000e+00> : vector<8xf32>
    %100 = vector.multi_reduction <add>, %99, %cst_33 [1] : vector<8x8xf32> to vector<8xf32>
    %101 = vector.shape_cast %100 : vector<8xf32> to vector<8x1xf32>
    %cst_34 = arith.constant 0.000000e+00 : f32
    %102 = vector.broadcast %cst_34 : f32 to vector<8x8xf32>
    %103 = arith.select %73, %61, %102 : vector<8x8xi1>, vector<8x8xf32>
    %cst_35 = arith.constant dense<0.000000e+00> : vector<8xf32>
    %104 = vector.multi_reduction <add>, %103, %cst_35 [1] : vector<8x8xf32> to vector<8xf32>
    %105 = vector.shape_cast %104 : vector<8xf32> to vector<8x1xf32>
    %106 = arith.extui %97 : vector<8x8xi1> to vector<8x8xi32>
    %107 = arith.sitofp %106 : vector<8x8xi32> to vector<8x8xf32>
    %cst_36 = arith.constant dense<0.000000e+00> : vector<8x1xf32>
    %108 = tpu.matmul %107, %32, %cst_36 {dimension_numbers = #tpu.dot_dimension_numbers<[1], [0], [0], [1], [0, 0, 1, 1], [], []>} : vector<8x8xf32>, vector<8x1xf32>, vector<8x1xf32> -> vector<8x1xf32>
    %109 = arith.extui %73 : vector<8x8xi1> to vector<8x8xi32>
    %110 = arith.sitofp %109 : vector<8x8xi32> to vector<8x8xf32>
    %cst_37 = arith.constant dense<0.000000e+00> : vector<8x1xf32>
    %111 = tpu.matmul %110, %32, %cst_37 {dimension_numbers = #tpu.dot_dimension_numbers<[1], [0], [0], [1], [0, 0, 1, 1], [], []>} : vector<8x8xf32>, vector<8x1xf32>, vector<8x1xf32> -> vector<8x1xf32>
    %112 = arith.addf %37, %108 : vector<8x1xf32>
    %cst_38 = arith.constant 2.000000e+00 : f32
    %113 = vector.broadcast %cst_38 : f32 to vector<8x1xf32>
    %114 = arith.mulf %113, %101 : vector<8x1xf32>
    %115 = arith.subf %112, %114 : vector<8x1xf32>
    %cst_39 = arith.constant 0.000000e+00 : f32
    %116 = vector.broadcast %cst_39 : f32 to vector<8x1xf32>
    %117 = arith.maximumf %115, %116 : vector<8x1xf32>
    %118 = math.sqrt %117 : vector<8x1xf32>
    %119 = arith.addf %37, %111 : vector<8x1xf32>
    %cst_40 = arith.constant 2.000000e+00 : f32
    %120 = vector.broadcast %cst_40 : f32 to vector<8x1xf32>
    %121 = arith.mulf %120, %105 : vector<8x1xf32>
    %122 = arith.subf %119, %121 : vector<8x1xf32>
    %cst_41 = arith.constant 0.000000e+00 : f32
    %123 = vector.broadcast %cst_41 : f32 to vector<8x1xf32>
    %124 = arith.maximumf %122, %123 : vector<8x1xf32>
    %125 = math.sqrt %124 : vector<8x1xf32>
    %c0_42 = arith.constant 0 : index
    %c0_43 = arith.constant 0 : index
    %126 = memref.load %arg6[%c0_42, %c0_43] : memref<1x1xf32, #tpu.memory_space<smem>>
    %127 = arith.subf %118, %125 : vector<8x1xf32>
    %128 = vector.broadcast %126 : f32 to vector<8x1xf32>
    %129 = arith.mulf %127, %128 : vector<8x1xf32>
    %130 = math.exp %129 : vector<8x1xf32>
    %cst_44 = arith.constant 1.000000e+00 : f32
    %131 = vector.broadcast %cst_44 : f32 to vector<8x1xf32>
    %132 = arith.addf %131, %130 : vector<8x1xf32>
    %133 = math.log %132 : vector<8x1xf32>
    %134 = arith.mulf %133, %60 : vector<8x1xf32>
    %c0_45 = arith.constant 0 : index
    %c0_46 = arith.constant 0 : index
    %135 = vector.load %arg7[%c0_45, %c0_46] : memref<8x1xf32, #tpu.memory_space<vmem>>, vector<8x1xf32>
    tpu.vector_store %arg7[%c0_45, %c0_46], %134 {strides = array<i32>} : memref<8x1xf32, #tpu.memory_space<vmem>>, vector<8x1xf32>,
    %c0_47 = arith.constant 0 : index
    %c0_48 = arith.constant 0 : index
    %136 = vector.load %arg8[%c0_47, %c0_48] : memref<8x1xf32, #tpu.memory_space<vmem>>, vector<8x1xf32>
    tpu.vector_store %arg8[%c0_47, %c0_48], %60 {strides = array<i32>} : memref<8x1xf32, #tpu.memory_space<vmem>>, vector<8x1xf32>,
    return
  }
  func.func @transform_0(%arg0: i32) -> (i32, i32) {
    %c0_i32 = arith.constant 0 : i32
    %c0_i32_0 = arith.constant 0 : i32
    %c0_i32_1 = arith.constant 0 : i32
    return %c0_i32, %c0_i32_0 : i32, i32
  }
  func.func @transform_1(%arg0: i32) -> (i32, i32) {
    %c0_i32 = arith.constant 0 : i32
    %c0_i32_0 = arith.constant 0 : i32
    return %arg0, %c0_i32 : i32, i32
  }
  func.func @transform_2(%arg0: i32) -> (i32, i32) {
    %c0_i32 = arith.constant 0 : i32
    %c0_i32_0 = arith.constant 0 : i32
    return %arg0, %c0_i32 : i32, i32
  }
  func.func @transform_3(%arg0: i32) -> (i32, i32) {
    %c0_i32 = arith.constant 0 : i32
    %c0_i32_0 = arith.constant 0 : i32
    %c0_i32_1 = arith.constant 0 : i32
    return %c0_i32, %c0_i32_0 : i32, i32
  }
  func.func @transform_4(%arg0: i32) -> (i32, i32) {
    %c0_i32 = arith.constant 0 : i32
    %c0_i32_0 = arith.constant 0 : i32
    return %arg0, %c0_i32 : i32, i32
  }
  func.func @transform_5(%arg0: i32) -> (i32, i32) {
    %c0_i32 = arith.constant 0 : i32
    %c0_i32_0 = arith.constant 0 : i32
    %c0_i32_1 = arith.constant 0 : i32
    return %c0_i32, %c0_i32_0 : i32, i32
  }
  func.func @transform_6(%arg0: i32) -> (i32, i32) {
    %c0_i32 = arith.constant 0 : i32
    %c0_i32_0 = arith.constant 0 : i32
    return %arg0, %c0_i32 : i32, i32
  }
  func.func @transform_7(%arg0: i32) -> (i32, i32) {
    %c0_i32 = arith.constant 0 : i32
    %c0_i32_0 = arith.constant 0 : i32
    return %arg0, %c0_i32 : i32, i32
  }
}

</mosaic_0001>

<bundles_post_ra>
// kernel: tpu_custom_call.1
= control target key start
LH: loop header
LB: loop body
LE: loop exit
PB: predicated region body
PF: predicated region fallthrough
CT: control target
= control target key end

     0   :  { %v363_v0 = vmov 0   ;;  %vm29_vm0 = vcmask 261120   ;;  %v112_v8 = vlaneseq  ;;  %v364_v14 = vmov 0.0   ;;  %s506_s2 = inlined_call_operand.vmem [shape: s32[8,1], index: 2, kind: input, shape index: {}]   ;;  %s507_s0 = inlined_call_operand.vmem [shape: f32[8,32], index: 0, kind: input, shape index: {}]   ;;  %s508_s1 = inlined_call_operand.vmem [shape: f32[8,32], index: 1, kind: input, shape index: {}]   ;;  %s509_s3 = inlined_call_operand.vmem [shape: s32[1,8], index: 3, kind: input, shape index: {}]   ;;  %s510_s4 = inlined_call_operand.vmem [shape: f32[8,1], index: 4, kind: input, shape index: {}]   ;;  %s511_s7 = inlined_call_operand.vmem [shape: f32[8,1], index: 7, kind: output, shape index: {1}]   ;;  %s512_s5 = inlined_call_operand.<no memory space> [shape: f32[1,1], index: 5, kind: input, shape index: {}]   ;;  %s513_s6 = inlined_call_operand.vmem [shape: f32[8,1], index: 6, kind: output, shape index: {0}]  }
   0x1   :  { %344 = vset.pattern.permute.xlu1 %v363_v0  ;;  %v110_v1 = vld [vmem:[%s506_s2] sm:$0xff]  ;;  %345 = vset.pattern.permute.xlu0 %v363_v0 }
   0x2   :  { %v414_v2 = vld [vmem:[%s507_s0] sm:$0xff]  ;;  %120 = vperm.xlu1 %344, %v110_v1   ;;  %v427_v9 = vand.u32 127, %v112_v8  ;;  %v115_v10 = vshrl.u32 %v112_v8, 7 }
   0x3   :  { %v28_v3 = vmul.f32 %v414_v2, %v414_v2  ;;  %v421_v4 = vld [vmem:[%s508_s1] sm:$0xff]  ;;  %s365_s1 = smov 1  }
   0x4   :  { %v62_v6 = vmul.f32 %v421_v4, %v421_v4  ;;  %v432_v11 = vld [vmem:[%s509_s3] ss:$0 sm:$0xff]  ;;  %vm124_vm1 = vcmp.ne.s32.totalorder %v115_v10, %v427_v9  ;;  %s366_s3 = smov 2  }
   0x5   :  { %v30_v5 = vsel %vm29_vm0, %v28_v3, 0.0 }
   0x6   :  { %31 = vadd.xlane.f32.xlu0 %v30_v5  ;;  %v63_v7 = vsel %vm29_vm0, %v62_v6, 0.0 }
   0xe   :  { %64 = vadd.xlane.f32.xlu0 %v63_v7 }
  0x74   :  { %v435_v12 = vpop.permute.xlu1 %120 }
  0x75   :  { %vm123_vm2 = vcmp.eq.s32.totalorder %v435_v12, %v432_v11 }
  0x76   :  { %vm442_vm3 = vmand %vm123_vm2, %vm124_vm1  ;;  %vm189_vm1 = vcmask 7168  }
  0x77   :  { %v449_v15 = vsel %vm442_vm3, 1.0, %v364_v14 }
  0x78   :  { %186 = vrot.lane.b32.xlu2 %v449_v15, %s365_s1 }
  0x79   :  { %v32_v16 = vpop.xlane.xlu0 %31 }
  0x7a   :  { %347 = vrsqrt.f32 %v32_v16  ;;  %vm40_vm4 = vcmp.eq.f32.partialorder %v32_v16, inf  ;;  %v43_v28 = vand.u32 2147483648, %v32_v16  ;;  %vm42_vm5 = vcmp.eq.f32.partialorder %v32_v16, 0.0 }
  0x80   :  { %v348_v17 = vpop.eup %347 }
  0x81   :  { %v34_v18 = vmul.f32 %v348_v17, %v32_v16  ;;  %v65_v19 = vpop.xlane.xlu0 %64 }
  0x82   :  { %349 = vrsqrt.f32 %v65_v19  ;;  %vm73_vm6 = vcmp.eq.f32.partialorder %v65_v19, inf  ;;  %v76_v36 = vand.u32 2147483648, %v65_v19  ;;  %vm75_vm7 = vcmp.eq.f32.partialorder %v65_v19, 0.0 }
  0x83   :  { %v35_v20 = vmul.f32 %v348_v17, %v34_v18 }
  0x85   :  { %v36_v21 = vmul.f32 0.5, %v35_v20 }
  0x87   :  { %v37_v22 = vsub.f32 1.5, %v36_v21 }
  0x88   :  { %v350_v23 = vpop.eup %349 }
  0x89   :  { %v67_v24 = vmul.f32 %v350_v23, %v65_v19  ;;  %v38_v25 = vmul.f32 %v348_v17, %v37_v22 }
  0x8b   :  { %v68_v26 = vmul.f32 %v350_v23, %v67_v24  ;;  %v39_v27 = vmul.f32 %v38_v25, %v32_v16 }
  0x8d   :  { %v69_v29 = vmul.f32 0.5, %v68_v26  ;;  %v41_v30 = vsel %vm40_vm4, %v32_v16, %v39_v27  ;;  %vm128_vm4 = vcmask 64512   ;;  %v207_v16 = vld [vmem:[%s510_s4] sm:$0xff]  ;;  %s367_s4 = smov 4  }
  0x8e   :  { %v44_v31 = vsel %vm42_vm5, %v43_v28, %v41_v30  ;;  %v129_v3 = vsel %vm128_vm4, %v449_v15, 0.0 }
  0x8f   :  { %v70_v32 = vsub.f32 1.5, %v69_v29  ;;  %v45_v33 = vmax.f32 %v44_v31, 1e-12 }
  0x91   :  { %v71_v34 = vmul.f32 %v350_v23, %v70_v32  ;;  %351 = vrcp.f32 %v45_v33  ;;  %v57_v43 = vand.u32 2147483648, %v45_v33  ;;  %v55_v45 = vand.u32 2147483647, %v45_v33 }
  0x92   :  { %vm51_vm9 = vweird.f32 %v45_v33 }
  0x93   :  { %v72_v35 = vmul.f32 %v71_v34, %v65_v19  ;;  %v58_v48 = vor.u32 1.1754944e-38, %v57_v43  ;;  %vm56_vm11 = vcmp.eq.f32.partialorder %v55_v45, 8.507059e+37 }
  0x95   :  { %v74_v37 = vsel %vm73_vm6, %v65_v19, %v72_v35 }
  0x96   :  { %v77_v38 = vsel %vm75_vm7, %v76_v36, %v74_v37 }
  0x97   :  { %v352_v39 = vpop.eup %351  ;;  %v78_v40 = vmax.f32 %v77_v38, 1e-12 }
  0x98   :  { %v47_v41 = vmul.f32 %v352_v39, %v45_v33  ;;  %vm52_vm8 = vweird.f32 %v352_v39 }
  0x99   :  { %353 = vrcp.f32 %v78_v40  ;;  %vm53_vm10 = vmor %vm51_vm9, %vm52_vm8  ;;  %v90_v55 = vand.u32 2147483648, %v78_v40  ;;  %v88_v57 = vand.u32 2147483647, %v78_v40  ;;  %vm84_vm13 = vweird.f32 %v78_v40 }
  0x9a   :  { %v48_v42 = vsub.f32 1.0, %v47_v41  ;;  %vm196_vm8 = vcmask 15360  }
  0x9b   :  { %v91_v59 = vor.u32 1.1754944e-38, %v90_v55  ;;  %vm89_vm15 = vcmp.eq.f32.partialorder %v88_v57, 8.507059e+37 }
  0x9c   :  { %v49_v44 = vmul.f32 %v352_v39, %v48_v42 }
  0x9e   :  { %v50_v46 = vadd.f32 %v352_v39, %v49_v44 }
  0x9f   :  { %v354_v47 = vpop.eup %353 }
  0xa0   :  { %v54_v49 = vsel %vm53_vm10, %v352_v39, %v50_v46  ;;  %v80_v50 = vmul.f32 %v354_v47, %v78_v40  ;;  %vm85_vm12 = vweird.f32 %v354_v47  ;;  %vm203_vm10 = vcmask 31744  }
  0xa1   :  { %v59_v51 = vsel %vm56_vm11, %v58_v48, %v54_v49  ;;  %vm86_vm14 = vmor %vm84_vm13, %vm85_vm12 }
  0xa2   :  { %v61_v52 = vmul.f32 %v59_v51, %v414_v2  ;;  %v95_v53 = vmul.f32 %v59_v51, %v44_v31  ;;  %v81_v54 = vsub.f32 1.0, %v80_v50 }
  0xa4   :  { %332 = vmatpush.xpose.msk.msra.mxu0 %vm29_vm0, %v61_v52  ;;  %v82_v56 = vmul.f32 %v354_v47, %v81_v54  ;;  %v99_v8 = vsel %vm29_vm0, %v61_v52, 0.0  ;;  %v96_v29 = vmul.f32 %v95_v53, %v95_v53 }
  0xa6   :  { %v83_v58 = vadd.f32 %v354_v47, %v82_v56 }
  0xa8   :  { %v87_v60 = vsel %vm86_vm14, %v354_v47, %v83_v58 }
  0xa9   :  { %v92_v61 = vsel %vm89_vm15, %v91_v59, %v87_v60 }
  0xaa   :  { %v94_v62 = vmul.f32 %v92_v61, %v421_v4  ;;  %v455_v63 = vmul.f32 %v92_v61, %v77_v38 }
  0xac   :  { %333 = vmatmul.msk.f32.vlgmr.msra.gmra.mxu0 %vm29_vm0, %v94_v62  ;;  %v102_v5 = vsel %vm29_vm0, %v94_v62, 0.0  ;;  %v98_v54 = vmul.f32 %v455_v63, %v455_v63 }
  0xd2   :  { %v187_v0 = vpop.permute.xlu2 %186 }
  0xd3   :  { %v190_v1 = vsel %vm189_vm1, 0.0, %v187_v0 }
  0xd4   :  { %v191_v2 = vadd.f32 %v449_v15, %v190_v1 }
  0xd6   :  { %193 = vrot.lane.b32.xlu0 %v191_v2, %s366_s3 }
 0x100   :  { %130 = vadd.xlane.f32.xlu0 %v129_v3 }
 0x108   :  { %103 = vadd.xlane.f32.xlu0 %v102_v5 }
 0x129   :  { %v463_v4 = vpop.f32.mrf.mxu0 }
 0x12a   :  { %v163_v6 = vsel %vm123_vm2, -inf, %v463_v4 }
 0x12b   :  { %v164_v7 = vsel %vm128_vm4, %v163_v6, -inf }
 0x12c   :  { %165 = vmax.xlane.f32.xlu1 %v164_v7 }
 0x134   :  { %100 = vadd.xlane.f32.xlu1 %v99_v8 }
 0x148   :  { %v194_v10 = vpop.permute.xlu0 %193 }
 0x149   :  { %v197_v35 = vsel %vm196_vm8, 0.0, %v194_v10 }
 0x14a   :  { %v198_v36 = vadd.f32 %v197_v35, %v191_v2 }
 0x173   :  { %v131_v17 = vpop.xlane.xlu0 %130 }
 0x174   :  { %vm132_vm5 = vcmp.gt.f32.partialorder %v131_v17, 0.0  ;;  %vm133_vm6 = vcmp.lt.f32.partialorder %v131_v17, 7.0  ;;  %v208_v18 = vmul.f32 %v207_v16, %v131_v17  ;;  %v334_v19 = vadd.f32 -1.0, %v131_v17 }
 0x175   :  { %vm134_vm7 = vmand %vm132_vm5, %vm133_vm6 }
 0x176   :  { %v475_v11 = vsel %vm134_vm7, 1.0, %v364_v14  ;;  %v209_v12 = vfloor.f32 %v208_v18  ;;  %v211_v20 = vmax.f32 %v334_v19, 0.0 }
 0x177   :  { %321 = vst.msk [vmem:[%s511_s7] sm:$0xff] %vm189_vm1, %v475_v11 }
 0x178   :  { %v212_v21 = vmin.f32 %v209_v12, %v211_v20 }
 0x17a   :  { %215 = vperm.xlu1 %344, %v212_v21  }
 0x17b   :  { %v104_v52 = vpop.xlane.xlu0 %103 }
 0x17c   :  { %v107_v53 = vmul.f32 2e-06, %v104_v52 }
 0x19f   :  { %v166_v22 = vpop.xlane.xlu1 %165 }
 0x1a0   :  { %vm167_vm0 = vcmp.eq.f32.partialorder %v163_v6, %v166_v22 }
 0x1a1   :  { %v168_v23 = vsel %vm167_vm0, %v427_v9, 8 }
 0x1a2   :  { %v169_v24 = vsel %vm128_vm4, %v168_v23, 2147483647 }
 0x1a3   :  { %v171_v25 = vshra.s32 %v169_v24, 16  ;;  %v170_v31 = vand.u32 65535, %v169_v24 }
 0x1a5   :  { %v173_v26 = vcvt.s32.f32 %v171_v25  ;;  %v172_v33 = vcvt.s32.f32 %v170_v31 }
 0x1a7   :  { %174 = vmin.xlane.f32.xlu2 %v173_v26  ;;  %v101_v27 = vpop.xlane.xlu1 %100 }
 0x1a8   :  { %v105_v28 = vmul.f32 2e-06, %v101_v27  ;;  %v312_v27 = vstv %s512_s5 }
 0x1aa   :  { %v106_v30 = vsub.f32 %v96_v29, %v105_v28 }
 0x1ac   :  { %248 = vmatpush.msra.mxu1 %v106_v30  ;;  %273 = vmatpush.msra.mxu2 %v106_v30 }
 0x1ec   :  { %v216_v49 = vpop.permute.xlu1 %215 }
 0x21a   :  { %v175_v32 = vpop.xlane.xlu2 %174 }
 0x21b   :  { %vm176_vm2 = vcmp.eq.f32.partialorder %v173_v26, %v175_v32  ;;  %v181_v37 = vcvt.f32.s32 %v175_v32 }
 0x21c   :  { %v177_v34 = vsel %vm176_vm2, %v172_v33, inf }
 0x21d   :  { %178 = vmin.xlane.f32.xlu2 %v177_v34  ;;  %v182_v39 = vshll.u32 %v181_v37, 16 }
 0x235   :  { %200 = vrot.lane.b32.xlu2 %v198_v36, %s367_s4 }
 0x290   :  { %v179_v38 = vpop.xlane.xlu2 %178 }
 0x291   :  { %v180_v40 = vcvt.f32.s32 %v179_v38 }
 0x293   :  { %v183_v41 = vadd.s32 %v182_v39, %v180_v40 }
 0x295   :  { %vm184_vm9 = vcmp.eq.s32.totalorder %v427_v9, %v183_v41 }
 0x296   :  { %v337_v42 = vsel %vm184_vm9, 1.0, %v364_v14  ;;  %v224_v43 = vsel %vm184_vm9, %v463_v4, 0.0 }
 0x297   :  { %338 = vmatmul.msk.f32.vlgmr.msra.gmra.mxu2 %vm128_vm4, %v337_v42  ;;  %v225_v44 = vsel %vm128_vm4, %v224_v43, 0.0 }
 0x298   :  { %v201_v45 = vpop.permute.xlu2 %200  ;;  %226 = vadd.xlane.f32.xlu1 %v225_v44 }
 0x299   :  { %v204_v46 = vsel %vm203_vm10, 0.0, %v201_v45 }
 0x29a   :  { %v205_v47 = vadd.f32 %v204_v46, %v198_v36 }
 0x29c   :  { %v206_v48 = vsub.f32 %v205_v47, %v449_v15  ;;  %v108_v15 = vadd.f32 %v107_v53, %v98_v54 }
 0x29e   :  { %vm218_vm11 = vcmp.eq.f32.partialorder %v206_v48, %v216_v49  ;;  %v109_v56 = vadd.f32 3.2e-11, %v108_v15 }
 0x29f   :  { %vm219_vm12 = vmand %vm442_vm3, %vm218_vm11 }
 0x2a0   :  { %v335_v9 = vsel %vm219_vm12, 1.0, %v364_v14  ;;  %v220_v50 = vsel %vm219_vm12, %v463_v4, 0.0 }
 0x2a1   :  { %336 = vmatmul.msk.f32.vlgmr.msra.gmra.mxu1 %vm128_vm4, %v335_v9  ;;  %v221_v51 = vsel %vm128_vm4, %v220_v50, 0.0 }
 0x2a2   :  { %222 = vadd.xlane.f32.xlu2 %v221_v51 }
 0x30b   :  { %v227_v55 = vpop.xlane.xlu1 %226 }
 0x30c   :  { %v295_v13 = vmul.f32 2.0, %v227_v55 }
 0x315   :  { %v223_v59 = vpop.xlane.xlu2 %222 }
 0x316   :  { %v279_v0 = vmul.f32 2.0, %v223_v59 }
 0x31a   :  { %v275_v57 = vpop.f32.mrf.mxu2 }
 0x31b   :  { %v294_v58 = vadd.f32 %v275_v57, %v109_v56 }
 0x31d   :  { %v296_v14 = vsub.f32 %v294_v58, %v295_v13 }
 0x31e   :  { %v250_v60 = vpop.f32.mrf.mxu1 }
 0x31f   :  { %v297_v61 = vmax.f32 %v296_v14, 0.0  ;;  %v278_v62 = vadd.f32 %v250_v60, %v109_v56 }
 0x321   :  { %355 = vrsqrt.f32 %v297_v61  ;;  %v280_v1 = vsub.f32 %v278_v62, %v279_v0  ;;  %vm305_vm3 = vcmp.eq.f32.partialorder %v297_v61, inf  ;;  %v308_v22 = vand.u32 2147483648, %v297_v61 }
 0x322   :  { %vm307_vm14 = vcmp.eq.f32.partialorder %v297_v61, 0.0 }
 0x323   :  { %v281_v2 = vmax.f32 %v280_v1, 0.0 }
 0x325   :  { %357 = vrsqrt.f32 %v281_v2  ;;  %vm289_vm13 = vcmp.eq.f32.partialorder %v281_v2, inf  ;;  %v292_v23 = vand.u32 2147483648, %v281_v2  ;;  %vm291_vm15 = vcmp.eq.f32.partialorder %v281_v2, 0.0 }
 0x327   :  { %v356_v3 = vpop.eup %355 }
 0x328   :  { %v299_v5 = vmul.f32 %v356_v3, %v297_v61 }
 0x32a   :  { %v300_v4 = vmul.f32 %v356_v3, %v299_v5 }
 0x32b   :  { %v358_v63 = vpop.eup %357 }
 0x32c   :  { %v301_v6 = vmul.f32 0.5, %v300_v4  ;;  %v283_v7 = vmul.f32 %v358_v63, %v281_v2 }
 0x32e   :  { %v302_v8 = vsub.f32 1.5, %v301_v6  ;;  %v284_v10 = vmul.f32 %v358_v63, %v283_v7 }
 0x330   :  { %v303_v16 = vmul.f32 %v356_v3, %v302_v8  ;;  %v285_v17 = vmul.f32 0.5, %v284_v10 }
 0x332   :  { %v304_v18 = vmul.f32 %v303_v16, %v297_v61  ;;  %v286_v19 = vsub.f32 1.5, %v285_v17 }
 0x334   :  { %v287_v12 = vmul.f32 %v358_v63, %v286_v19  ;;  %v306_v20 = vsel %vm305_vm3, %v297_v61, %v304_v18 }
 0x335   :  { %v309_v25 = vsel %vm307_vm14, %v308_v22, %v306_v20 }
 0x336   :  { %v288_v21 = vmul.f32 %v287_v12, %v281_v2 }
 0x338   :  { %v290_v24 = vsel %vm289_vm13, %v281_v2, %v288_v21 }
 0x339   :  { %v293_v26 = vsel %vm291_vm15, %v292_v23, %v290_v24 }
 0x33a   :  { %v311_v28 = vsub.f32 %v293_v26, %v309_v25 }
 0x33c   :  { %v313_v29 = vmul.f32 %v312_v27, %v311_v28 }
 0x33e   :  { %v314_v30 = vmul.f32 1.442695, %v313_v29 }
 0x340   :  { %359 = vpow2.f32 %v314_v30 }
 0x346   :  { %v360_v31 = vpop.eup %359 }
 0x347   :  { %v316_v32 = vadd.f32 1.0, %v360_v31 }
 0x349   :  { %361 = vlog2.f32 %v316_v32 }
 0x34f   :  { %v362_v33 = vpop.eup %361 }
 0x350   :  { %v318_v34 = vmul.f32 0.6931472, %v362_v33 }
 0x352   :  { %v319_v35 = vmul.f32 %v475_v11, %v318_v34 }
 0x354   :  { %320 = vst.msk [vmem:[%s513_s6] sm:$0xff] %vm189_vm1, %v319_v35 }

</bundles_post_ra>
